<compile_context>
chip_gen: v5e
topology: v5e:2x2
jax: 0.10.0
libtpu: 0.0.40
codegen_flags: <defaults>
</compile_context>

<pallas_src>
import jax
import jax.numpy as jnp
import numpy as np
from jax.experimental import pallas as pl
from jax.experimental.pallas import tpu as pltpu


def sgnn_kernel(x_ref, wf_ref, b_ref, out_ref):
    # x_ref : (tile_n, F) bf16  node-feature tile (pipelined)
    # wf_ref: (C, F)      bf16  fused classifier (Wq^T @ W^T)^T, resident constant
    # b_ref : (C, 1)      f32   classifier bias
    # out_ref:(C, tile_n) f32   transposed, lane-dense output tile
    #
    # out = W_fused^T @ x^T == (x @ W_fused)^T ; contract over F on both operands so the
    # result lands directly in the lane-dense (C, tile_n) layout.
    acc = jax.lax.dot_general(
        wf_ref[...],
        x_ref[...],
        dimension_numbers=(((1,), (1,)), ((), ())),
        preferred_element_type=jnp.float32,
    )
    out_ref[...] = acc + b_ref[...]


def sgnn_forward(x, edge_index, wq_t, wo_t, b, *, max_tile_n=1024):
    """x: (N, F) f32; edge_index: (2, E) int32 (unused until LA layers exist).
    wq_t = linear_q.weight.T (F, H); wo_t = linear.weight.T (H, C); b: (C,)."""
    del edge_index  # TODO(synk): would feed LACombinedUp/Down message passing (num_h_layers==0).
    N, F = x.shape
    H, C = wo_t.shape
    assert wq_t.shape == (F, H)

    # Algebraic fusion of linear_q and the classifier (model is affine with no hidden layers).
    # Cast to bf16 AFTER the f32 fusion matmul; the transpose after the cast is exact.
    wf_ct = jnp.dot(wq_t, wo_t).astype(jnp.bfloat16).T          # (C, F) bf16
    x_b = x.astype(jnp.bfloat16)                                # (N, F) bf16
    b_col = b.astype(jnp.float32).reshape(C, 1)                 # (C, 1) f32

    # One grid step for small N; otherwise 128-aligned tiles (512-1024 rows ~ HBM roofline).
    tile_n = min(pl.cdiv(N, 128) * 128, max_tile_n)
    grid = (pl.cdiv(N, tile_n),)

    out_t = pl.pallas_call(
        sgnn_kernel,
        out_shape=jax.ShapeDtypeStruct((C, N), jnp.float32),    # transposed; no lane padding
        grid_spec=pltpu.PrefetchScalarGridSpec(
            num_scalar_prefetch=0,
            grid=grid,
            in_specs=[
                # x tile: pipelined (double-buffered) along the node grid axis.
                pl.BlockSpec((tile_n, F), lambda i: (i, 0)),
                # Constant fused weight / bias: single-buffered resident blocks.
                pl.BlockSpec((C, F), lambda i: (0, 0), pipeline_mode=pl.Buffered(1)),
                pl.BlockSpec((C, 1), lambda i: (0, 0), pipeline_mode=pl.Buffered(1)),
            ],
            out_specs=pl.BlockSpec((C, tile_n), lambda i: (0, i)),
        ),
        # VMEM per step (bf16 x tile + f32 out tile, double-buffered x) stays well under the
        # default scoped limit on v5e/v6e/v7x at tile_n<=1024, F=32; set vmem_limit_bytes
        # explicitly only once F/H or tile_n grow substantially.
        compiler_params=pltpu.CompilerParams(
            dimension_semantics=("parallel",),
        ),
    )(x_b, wf_ct, b_col)

    # Module-compatible (N, C) layout; consumers that can read (C, N) directly should skip this.
    return out_t.T


def init_params(key, num_features, hidden, num_classes):
    """Deterministic init mimicking torch.nn.Linear defaults (weights stored transposed)."""
    k1, k2, k3, k4 = jax.random.split(key, 4)
    lim_pq = 1.0 / np.sqrt(num_features)
    lim_o = 1.0 / np.sqrt(hidden)
    # wp_t mirrors linear_p but its output p only feeds the (absent) LA layers -> unused.
    wp_t = jax.random.uniform(k1, (num_features, hidden), jnp.float32, -lim_pq, lim_pq)
    wq_t = jax.random.uniform(k2, (num_features, hidden), jnp.float32, -lim_pq, lim_pq)
    wo_t = jax.random.uniform(k3, (hidden, num_classes), jnp.float32, -lim_o, lim_o)
    b = jax.random.uniform(k4, (num_classes,), jnp.float32, -lim_o, lim_o)
    return wp_t, wq_t, wo_t, b


if __name__ == "__main__":
    # opt = {'num_features': 32, 'hidden': 32, 'num_classes': 8,
    #        'input_dropout': 0.0, 'num_h_layers': 0}
    # N is deliberately not a tile multiple to exercise the partial-edge-block path.
    N, F, H, C, E = 250, 32, 32, 8, 512

    key = jax.random.PRNGKey(0)
    kx, ke, kp = jax.random.split(key, 3)
    x = jax.random.normal(kx, (N, F), jnp.float32)
    edge_index = jax.random.randint(ke, (2, E), 0, N, jnp.int32)
    wp_t, wq_t, wo_t, b = init_params(kp, F, H, C)
    del wp_t  # dead until LACombinedUp/Down layers exist (num_h_layers == 0)

    out = sgnn_forward(x, edge_index, wq_t, wo_t, b)
    out = jax.block_until_ready(out)
    assert out.shape == (N, C)

    # Reference built from the SAME bf16-rounded operands the kernel consumes
    # (fusion + bf16 cast change rounding vs the original two-f32-matmul order).
    wf_b = jnp.dot(wq_t, wo_t).astype(jnp.bfloat16).astype(jnp.float32)   # (F, C)
    x_bf = x.astype(jnp.bfloat16).astype(jnp.float32)                     # (N, F)
    ref = np.asarray(x_bf) @ np.asarray(wf_b) + np.asarray(b)[None, :]
    np.testing.assert_allclose(np.asarray(out), ref, rtol=1e-5, atol=1e-5)

    print("KERNEL_OK")
</pallas_src>

<mosaic_0001>
module attributes {stable_mosaic.version = 11 : i64} {
  func.func @sgnn_kernel(%arg0: i32, %arg1: memref<256x32xbf16, #tpu.memory_space<vmem>>, %arg2: memref<8x32xbf16, #tpu.memory_space<vmem>>, %arg3: memref<8x1xf32, #tpu.memory_space<vmem>>, %arg4: memref<8x256xf32, #tpu.memory_space<vmem>>) attributes {dimension_semantics = [#tpu.dimension_semantics<parallel>], iteration_bounds = array<i64: 1>, scalar_prefetch = 0 : i64, scratch_operands = 0 : i64, tpu.core_type = #tpu.core_type<tc>, window_params = [{transform_indices = @transform_0, window_bounds = array<i64: 256, 32>}, {pipeline_mode = #tpu.pipeline_mode<synchronous>, transform_indices = @transform_1, window_bounds = array<i64: 8, 32>}, {pipeline_mode = #tpu.pipeline_mode<synchronous>, transform_indices = @transform_2, window_bounds = array<i64: 8, 1>}, {transform_indices = @transform_3, window_bounds = array<i64: 8, 256>}]} {
    %c0 = arith.constant 0 : index
    %c0_0 = arith.constant 0 : index
    %0 = vector.load %arg2[%c0, %c0_0] : memref<8x32xbf16, #tpu.memory_space<vmem>>, vector<8x32xbf16>
    %c0_1 = arith.constant 0 : index
    %c0_2 = arith.constant 0 : index
    %1 = vector.load %arg1[%c0_1, %c0_2] : memref<256x32xbf16, #tpu.memory_space<vmem>>, vector<256x32xbf16>
    %cst = arith.constant dense<0.000000e+00> : vector<8x256xf32>
    %2 = tpu.matmul %0, %1, %cst {dimension_numbers = #tpu.dot_dimension_numbers<[1], [1], [0], [0], [0, 0, 1, 0], [], []>} : vector<8x32xbf16>, vector<256x32xbf16>, vector<8x256xf32> -> vector<8x256xf32>
    %c0_3 = arith.constant 0 : index
    %c0_4 = arith.constant 0 : index
    %3 = vector.load %arg3[%c0_3, %c0_4] : memref<8x1xf32, #tpu.memory_space<vmem>>, vector<8x1xf32>
    %4 = vector.broadcast %3 : vector<8x1xf32> to vector<8x256xf32>
    %5 = arith.addf %2, %4 : vector<8x256xf32>
    %c0_5 = arith.constant 0 : index
    %c0_6 = arith.constant 0 : index
    %6 = vector.load %arg4[%c0_5, %c0_6] : memref<8x256xf32, #tpu.memory_space<vmem>>, vector<8x256xf32>
    tpu.vector_store %arg4[%c0_5, %c0_6], %5 {strides = array<i32>} : memref<8x256xf32, #tpu.memory_space<vmem>>, vector<8x256xf32>,
    return
  }
  func.func @transform_0(%arg0: i32) -> (i32, i32) {
    %c0_i32 = arith.constant 0 : i32
    %c0_i32_0 = arith.constant 0 : i32
    return %arg0, %c0_i32 : i32, i32
  }
  func.func @transform_1(%arg0: i32) -> (i32, i32) {
    %c0_i32 = arith.constant 0 : i32
    %c0_i32_0 = arith.constant 0 : i32
    %c0_i32_1 = arith.constant 0 : i32
    return %c0_i32, %c0_i32_0 : i32, i32
  }
  func.func @transform_2(%arg0: i32) -> (i32, i32) {
    %c0_i32 = arith.constant 0 : i32
    %c0_i32_0 = arith.constant 0 : i32
    %c0_i32_1 = arith.constant 0 : i32
    return %c0_i32, %c0_i32_0 : i32, i32
  }
  func.func @transform_3(%arg0: i32) -> (i32, i32) {
    %c0_i32 = arith.constant 0 : i32
    %c0_i32_0 = arith.constant 0 : i32
    return %c0_i32, %arg0 : i32, i32
  }
}

</mosaic_0001>

<bundles_post_ra>
// kernel: tpu_custom_call.1
= control target key start
LH: loop header
LB: loop body
LE: loop exit
PB: predicated region body
PF: predicated region fallthrough
CT: control target
= control target key end

     0   :  { %vm134_vm0 = vcmask 261120   ;;  %s438_s0 = inlined_call_operand.vmem [shape: bf16[250,32], index: 0, kind: input, shape index: {}]   ;;  %s439_s1 = inlined_call_operand.vmem [shape: bf16[8,32], index: 1, kind: input, shape index: {}]   ;;  %s440_s2 = inlined_call_operand.vmem [shape: f32[8,1], index: 2, kind: input, shape index: {}]   ;;  %s441_s3 = inlined_call_operand.hbm [shape: f32[8,250], index: 3, kind: output, shape index: {}]  }
   0x1   :  { %v303_v0 = vld [vmem:[%s438_s0 + $0x38] sm:$0xff]  ;;  %v302_v4 = vld [vmem:[%s438_s0 + $0x30] sm:$0xff] }
   0x2   :  { %v311_v1 = vld [vmem:[%s438_s0 + $0x78] sm:$0xff]  ;;  %v160_v2 = vsel %vm134_vm0, %v303_v0, 0  ;;  %v310_v5 = vld [vmem:[%s438_s0 + $0x70] sm:$0xff] }
   0x3   :  { %v184_v3 = vsel %vm134_vm0, %v311_v1, 0  ;;  %186 = vmatpush.bf16.xpose.msra.mxu0 %v160_v2 }
   0x4   :  { %199 = vmatpush.bf16.xpose.msra.mxu1 %v184_v3 }
   0x5   :  { %8 = vsyncpa [#allocation3], 0  ;;  %v157_v6 = vsel %vm134_vm0, %v302_v4, 0  ;;  %v181_v7 = vsel %vm134_vm0, %v310_v5, 0  ;;  %v301_v8 = vld [vmem:[%s438_s0 + $0x28] sm:$0xff]  ;;  %v300_v12 = vld [vmem:[%s438_s0 + $0x20] sm:$0xff] }
   0x6   :  { %v309_v9 = vld [vmem:[%s438_s0 + $0x68] sm:$0xff]  ;;  %v154_v10 = vsel %vm134_vm0, %v301_v8, 0  ;;  %v308_v13 = vld [vmem:[%s438_s0 + $0x60] sm:$0xff]  ;;  %v151_v14 = vsel %vm134_vm0, %v300_v12, 0  ;;  %v299_v16 = vld [vmem:[%s438_s0 + $0x18] sm:$0xff]  ;;  %v341_v23 = vmov 0  }
   0x7   :  { %v178_v11 = vsel %vm134_vm0, %v309_v9, 0  ;;  %v175_v15 = vsel %vm134_vm0, %v308_v13, 0  ;;  %v307_v17 = vld [vmem:[%s438_s0 + $0x58] sm:$0xff]  ;;  %v148_v18 = vsel %vm134_vm0, %v299_v16, 0  ;;  %v48_v20 = vld [vmem:[%s440_s2] sm:$0xff]  ;;  %v298_v21 = vld [vmem:[%s438_s0 + $0x10] sm:$0xff]  ;;  %314 = vset.pattern.permute.xlu0 %v341_v23 }
   0x8   :  { %v172_v19 = vsel %vm134_vm0, %v307_v17, 0  ;;  %v306_v22 = vld [vmem:[%s438_s0 + $0x50] sm:$0xff]  ;;  %51 = vperm.xlu0 %314, %v48_v20   ;;  %v145_v24 = vsel %vm134_vm0, %v298_v21, 0  ;;  %v297_v26 = vld [vmem:[%s438_s0 + $0x8] sm:$0xff]  ;;  %v296_v30 = vld [vmem:[%s438_s0] sm:$0xff]  ;;  %s342_s20 = smov [#allocation2]  }
   0x9   :  { %v169_v25 = vsel %vm134_vm0, %v306_v22, 0  ;;  %v305_v27 = vld [vmem:[%s438_s0 + $0x48] sm:$0xff]  ;;  %v142_v28 = vsel %vm134_vm0, %v297_v26, 0  ;;  %v304_v31 = vld [vmem:[%s438_s0 + $0x40] sm:$0xff]  ;;  %v139_v32 = vsel %vm134_vm0, %v296_v30, 0  ;;  %s219_s21 = sshll.u32 %s342_s20, 4  ;;  %s220_s21 = int_to_ptr.vmem [resolvable:$true] %s219_s21 }
   0xa   :  { %v166_v29 = vsel %vm134_vm0, %v305_v27, 0  ;;  %v163_v33 = vsel %vm134_vm0, %v304_v31, 0  ;;  %v15_v34 = vld [vmem:[%s439_s1] sm:$0xf]  ;;  %s221_s0 = sshll.u32 %s441_s3, 4  ;;  %s222_s0 = int_to_ptr.hbm [resolvable:$true] %s221_s0 }
   0xb   :  { %187 = vmatpush.bf16.xpose.msra.mxu0 %v157_v6 }
   0xc   :  { %200 = vmatpush.bf16.xpose.msra.mxu1 %v181_v7 }
  0x13   :  { %188 = vmatpush.bf16.xpose.msra.mxu0 %v154_v10 }
  0x14   :  { %201 = vmatpush.bf16.xpose.msra.mxu1 %v178_v11 }
  0x1b   :  { %189 = vmatpush.bf16.xpose.msra.mxu0 %v151_v14 }
  0x1c   :  { %202 = vmatpush.bf16.xpose.msra.mxu1 %v175_v15 }
  0x23   :  { %190 = vmatpush.bf16.xpose.msra.mxu0 %v148_v18 }
  0x24   :  { %203 = vmatpush.bf16.xpose.msra.mxu1 %v172_v19 }
  0x2b   :  { %191 = vmatpush.bf16.xpose.msra.mxu0 %v145_v24 }
  0x2c   :  { %204 = vmatpush.bf16.xpose.msra.mxu1 %v169_v25 }
  0x33   :  { %192 = vmatpush.bf16.xpose.msra.mxu0 %v142_v28 }
  0x34   :  { %205 = vmatpush.bf16.xpose.msra.mxu1 %v166_v29 }
  0x3b   :  { %193 = vmatpush.bf16.xpose.msra.mxu0 %v139_v32 }
  0x3c   :  { %206 = vmatpush.bf16.xpose.msra.mxu1 %v163_v33 }
  0x42   :  { %294 = vmatmul.msk.bf16.vlgmr.msra.gmra.mxu0 %vm134_vm0, %v15_v34 }
  0x43   :  { %295 = vmatmul.msk.bf16.vlgmr.msra.gmra.mxu1 %vm134_vm0, %v15_v34 }
  0x7a   :  { %v52_v35 = vpop.permute.xlu0 %51 }
  0xbf   :  { %v195_v36 = vpop.f32.mrf.mxu0 }
  0xc0   :  { %v208_v37 = vpop.f32.mrf.mxu1  ;;  %v196_v38 = vadd.f32 %v195_v36, %v52_v35 }
  0xc1   :  { %v209_v39 = vadd.f32 %v208_v37, %v52_v35 }
  0xc2   :  { %212 = vst [vmem:[#allocation2] sm:$0xff] %v196_v38 }
  0xc3   :  { %213 = vst [vmem:[#allocation2 + $0x8] sm:$0xff] %v209_v39 }
  0xc4   :  { %224 = dma.vmem_to_hbm [thread:$0]  %s220_s21, 256, %s222_s0, [#allocation3]  }
  0xc7   :  { %v197_v40 = vpop.f32.mrf.mxu0 }
  0xc8   :  { %v210_v41 = vpop.f32.mrf.mxu1 }
  0xc9   :  { %339 = dma.done.wait [#allocation3], 256  }
  0xca   :  { %340 = vsyncadd [#allocation3], 4294967040 }
  0xcb   :  { %229 = vsyncpa [#allocation3], 1 }

</bundles_post_ra>
